<compile_context>
chip_gen: v7x
topology: tpu7x:2x2x1
jax: 0.10.0
libtpu: 0.0.40
codegen_flags: <defaults>
</compile_context>

<pallas_src>
import jax
import jax.numpy as jnp
from jax.experimental import pallas as pl
from jax.experimental.pallas import tpu as pltpu


def _msz_copy_kernel(x_hbm, o_hbm, copy_sem):
    # Whole-tensor HBM -> HBM DMA; no VMEM transit, no vector-unit traffic.
    cp = pltpu.make_async_copy(x_hbm, o_hbm, copy_sem)
    cp.start()
    cp.wait()


def _msz_materialized_copy(x):
    """Materialize a fresh buffer holding a bitwise copy of `x` via one DMA."""
    return pl.pallas_call(
        _msz_copy_kernel,
        out_shape=jax.ShapeDtypeStruct(x.shape, x.dtype),
        in_specs=[pl.BlockSpec(memory_space=pl.ANY)],   # leave input in HBM
        out_specs=pl.BlockSpec(memory_space=pl.ANY),    # output stays in HBM
        scratch_shapes=[pltpu.SemaphoreType.DMA],
    )(x)


@jax.jit
def msz_forward(text_feats, video_feats, audio_feats, label_ids):
    """Pallas implementation of MSZ.forward (pass-through of text_feats).

    video_feats / audio_feats / label_ids mirror the PyTorch signature but
    (like the reference module) contribute no computation.

    Note: the optimal implementation of this module is `return text_feats`
    (zero-byte roofline).  The Pallas DMA copy below is kept only because a
    materialized kernel output is required for this exercise.
    """
    del video_feats, audio_feats, label_ids  # unused by the reference module
    return _msz_materialized_copy(text_feats)


if __name__ == "__main__":
    key = jax.random.PRNGKey(0)
    k_t, k_v, k_a, k_l = jax.random.split(key, 4)

    B, S, H = 2, 8, 32
    text_feats = jax.random.normal(k_t, (B, S, H), dtype=jnp.float32)
    video_feats = jax.random.normal(k_v, (B, S, H), dtype=jnp.float32)
    audio_feats = jax.random.normal(k_a, (B, S, H), dtype=jnp.float32)
    label_ids = jax.random.randint(k_l, (B,), 0, 4, dtype=jnp.int32)

    outputs = msz_forward(text_feats, video_feats, audio_feats, label_ids)
    outputs = jax.block_until_ready(outputs)

    # sanity check: pass-through semantics, exact bitwise copy
    assert outputs.shape == (B, S, H)
    assert outputs.dtype == text_feats.dtype
    assert bool(jnp.all(outputs == text_feats))

    print("KERNEL_OK")
</pallas_src>

<mosaic_0001>
module attributes {stable_mosaic.version = 11 : i64} {
  func.func @_msz_copy_kernel(%arg0: memref<2x8x32xf32, #tpu.memory_space<any>>, %arg1: memref<2x8x32xf32, #tpu.memory_space<any>>, %arg2: memref<!tpu.dma_semaphore, #tpu.memory_space<semaphore_mem>>) attributes {dimension_semantics = [], scalar_prefetch = 0 : i64, scratch_operands = 1 : i64, tpu.core_type = #tpu.core_type<tc>} {
    tpu.enqueue_dma source(%arg0 : memref<2x8x32xf32, #tpu.memory_space<any>>) target(%arg1 : memref<2x8x32xf32, #tpu.memory_space<any>>) target_semaphore(%arg2 : memref<!tpu.dma_semaphore, #tpu.memory_space<semaphore_mem>>)
    tpu.wait_dma2 semaphore(%arg2 : memref<!tpu.dma_semaphore, #tpu.memory_space<semaphore_mem>>) src(%arg0 : memref<2x8x32xf32, #tpu.memory_space<any>>) dst(%arg1 : memref<2x8x32xf32, #tpu.memory_space<any>>)
    return
  }
}

</mosaic_0001>

<bundles_post_ra>
// kernel: msz_forward.1
= control target key start
LH: loop header
LB: loop body
LE: loop exit
PB: predicated region body
PF: predicated region fallthrough
CT: control target
= control target key end

     0   :  { %s35_s6 = smov [#allocation2]   ;;  %s36_s7 = smov [#allocation3]   ;;  %s54_s0 = inlined_call_operand.hbm [shape: f32[2,8,32], index: 0, kind: input, shape index: {}]   ;;  %s55_s1 = inlined_call_operand.hbm [shape: f32[2,8,32], index: 1, kind: output, shape index: {}]  }
   0x1   :  { %s37_s8 = smov 0  }
   0x2   :  { %18 = dma.general %s54_s0, 256, %s55_s1, %s35_s6, %s36_s7, [#allocation4], %s37_s8, 0  }
   0x3   :  { %33 = dma.done.wait [#allocation2], 256 }
   0x4   :  { %34 = vsyncadd [#allocation2], 4294967040 }
   0x5   :  { %23 = vsyncmov [#allocation2] }
   0x8   :  { %s24_s13 = vpop.sfrf %23 }
   0x9   :  { %p29_p0 = scmp.ne.s32.totalorder %s24_s13, 0 }
   0xb   :  { %28 = shalt.err (%p29_p0)  }

</bundles_post_ra>
